<compile_context>
chip_gen: v7x
topology: tpu7x:2x2x1
jax: 0.10.0
libtpu: 0.0.40
codegen_flags: <defaults>
</compile_context>

<pallas_src>
import jax
import jax.numpy as jnp
from jax.experimental import pallas as pl
from jax.experimental.pallas import tpu as pltpu


def _round_up(x, m):
    return (x + m - 1) // m * m


def critic_kernel(x_ref, w1_ref, w2_ref, small_ref, b3_ref, out_ref):
    """One batch tile of the critic MLP, batch on the lane axis.

    x_ref:     [K_pad, TILE_B]  state^T, zero-padded rows >= state_dim
    w1_ref:    [H_pad, K_pad]   fc1 weight, PyTorch [out, in] layout, zero-padded
    w2_ref:    [H_pad, H_pad]   fc2 weight, zero-padded
    small_ref: [H_pad, 8]       col 0 = b1, col 1 = b2, col 2 = w3 (fc3 weight row)
    b3_ref:    [1, 1] (SMEM)    fc3 bias scalar
    out_ref:   [1, TILE_B]      value^T (lane-dense)
    """
    x = x_ref[...]
    sp = small_ref[...]
    b1 = sp[:, 0:1]                      # [H_pad, 1] -> lane-broadcast bias
    b2 = sp[:, 1:2]
    w3 = sp[:, 2:3]

    # fc1 + relu : MXU matmul, f32 accumulation, bias/ReLU on the VPU.
    h1 = jnp.dot(w1_ref[...], x, preferred_element_type=jnp.float32) + b1
    h1 = jnp.maximum(h1, 0.0)            # [H_pad, TILE_B]

    # fc2 + relu
    h2 = jnp.dot(w2_ref[...], h1, preferred_element_type=jnp.float32) + b2
    h2 = jnp.maximum(h2, 0.0)            # [H_pad, TILE_B]

    # fc3 (single output unit): VPU multiply + sublane reduce instead of an N=1 matmul.
    v = jnp.sum(h2 * w3, axis=0, keepdims=True) + b3_ref[0, 0]   # [1, TILE_B]
    out_ref[...] = v.astype(out_ref.dtype)


def pack_params(params, state_dim, hidden_dim):
    """One-time layout plumbing: pad to lane-aligned shapes and pack the small vectors."""
    k_pad = _round_up(max(state_dim, 1), 128)
    h_pad = _round_up(hidden_dim, 128)
    w1 = jnp.zeros((h_pad, k_pad), jnp.float32).at[:hidden_dim, :state_dim].set(
        params["w1"].astype(jnp.float32))
    w2 = jnp.zeros((h_pad, h_pad), jnp.float32).at[:hidden_dim, :hidden_dim].set(
        params["w2"].astype(jnp.float32))
    small = jnp.zeros((h_pad, 8), jnp.float32)
    small = small.at[:hidden_dim, 0].set(params["b1"].reshape(-1).astype(jnp.float32))
    small = small.at[:hidden_dim, 1].set(params["b2"].reshape(-1).astype(jnp.float32))
    small = small.at[:hidden_dim, 2].set(params["w3"].reshape(-1).astype(jnp.float32))
    b3 = jnp.asarray(params["b3"], jnp.float32).reshape(1, 1)
    return {"w1": w1, "w2": w2, "small": small, "b3": b3}


def critic_forward(state, packed, *, tile_b_max=1024):
    """state: [B, state_dim] f32; packed: output of pack_params. Returns [B, 1] f32."""
    B, S = state.shape
    w1, w2, small, b3 = packed["w1"], packed["w2"], packed["small"], packed["b3"]
    h_pad, k_pad = w1.shape
    assert S <= k_pad

    # Batch tiling: lane-dense tiles (multiple of 128); single tile for small B.
    b_pad = _round_up(B, 128)
    if b_pad <= tile_b_max:
        tile_b = b_pad
    else:
        tile_b = tile_b_max                       # multiple of 128
        b_pad = _round_up(B, tile_b)
    grid = (b_pad // tile_b,)

    # Zero-pad + transpose the state once in XLA (exact): [B, S] -> [K_pad, B_pad].
    x_t = jnp.zeros((k_pad, b_pad), jnp.float32).at[:S, :B].set(
        state.astype(jnp.float32).T)

    out = pl.pallas_call(
        critic_kernel,
        out_shape=jax.ShapeDtypeStruct((1, b_pad), jnp.float32),
        grid=grid,
        in_specs=[
            pl.BlockSpec((k_pad, tile_b), lambda i: (0, i)),      # state^T tile (pipelined)
            pl.BlockSpec((h_pad, k_pad), lambda i: (0, 0)),       # fc1 W (VMEM-resident)
            pl.BlockSpec((h_pad, h_pad), lambda i: (0, 0)),       # fc2 W (VMEM-resident)
            pl.BlockSpec((h_pad, 8), lambda i: (0, 0)),           # packed b1/b2/w3
            pl.BlockSpec((1, 1), lambda i: (0, 0),
                         memory_space=pltpu.MemorySpace.SMEM),    # fc3 bias scalar
        ],
        out_specs=pl.BlockSpec((1, tile_b), lambda i: (0, i)),    # lane-dense value row
        compiler_params=pltpu.CompilerParams(
            dimension_semantics=("parallel",),                    # shard batch across TCs (v7x)
        ),
    )(x_t, w1, w2, small, b3)

    return out[0, :B][:, None]                                    # [B, 1]


def init_params(key, state_dim, hidden_dim):
    """Deterministic init mimicking nn.Linear default (uniform +- 1/sqrt(fan_in)).
    Weights kept in PyTorch [out_features, in_features] layout, biases [1, out]."""
    ks = jax.random.split(key, 6)

    def linear(kw, kb, fan_in, fan_out):
        bound = 1.0 / jnp.sqrt(jnp.float32(fan_in))
        w = jax.random.uniform(kw, (fan_out, fan_in), jnp.float32, -bound, bound)
        b = jax.random.uniform(kb, (1, fan_out), jnp.float32, -bound, bound)
        return w, b

    w1, b1 = linear(ks[0], ks[1], state_dim, hidden_dim)
    w2, b2 = linear(ks[2], ks[3], hidden_dim, hidden_dim)
    w3, b3 = linear(ks[4], ks[5], hidden_dim, 1)
    return {"w1": w1, "b1": b1, "w2": w2, "b2": b2, "w3": w3, "b3": b3}


def critic_ref(state, p):
    """Pure-JAX reference of the PyTorch forward for verification."""
    h1 = jnp.maximum(state @ p["w1"].T + p["b1"], 0.0)
    h2 = jnp.maximum(h1 @ p["w2"].T + p["b2"], 0.0)
    return h2 @ p["w3"].T + p["b3"]


if __name__ == "__main__":
    # PowerDispatchEnv observation_space has shape (2,) -> state_dim = 2.
    state_dim = 2
    hidden_dim = 32
    batch = 8

    key = jax.random.PRNGKey(0)
    k_params, k_state = jax.random.split(key)
    params = init_params(k_params, state_dim, hidden_dim)
    state = jax.random.uniform(k_state, (batch, state_dim), jnp.float32, 0.0, 100.0)

    packed = pack_params(params, state_dim, hidden_dim)
    value = critic_forward(state, packed)
    value = jax.block_until_ready(value)

    ref = critic_ref(state, params)
    assert value.shape == (batch, 1)
    assert jnp.allclose(value, ref, atol=1e-3, rtol=1e-3), "mismatch vs reference"

    print("KERNEL_OK")
</pallas_src>

<mosaic_0001>
module attributes {stable_mosaic.version = 11 : i64} {
  func.func @critic_kernel(%arg0: i32, %arg1: memref<128x128xf32, #tpu.memory_space<vmem>>, %arg2: memref<128x128xf32, #tpu.memory_space<vmem>>, %arg3: memref<128x128xf32, #tpu.memory_space<vmem>>, %arg4: memref<128x8xf32, #tpu.memory_space<vmem>>, %arg5: memref<1x1xf32, #tpu.memory_space<smem>>, %arg6: memref<1x128xf32, #tpu.memory_space<vmem>>) attributes {dimension_semantics = [#tpu.dimension_semantics<parallel>], iteration_bounds = array<i64: 1>, scalar_prefetch = 0 : i64, scratch_operands = 0 : i64, tpu.core_type = #tpu.core_type<tc>, window_params = [{transform_indices = @transform_0, window_bounds = array<i64: 128, 128>}, {pipeline_mode = #tpu.pipeline_mode<synchronous>, transform_indices = @transform_1, window_bounds = array<i64: 128, 128>}, {pipeline_mode = #tpu.pipeline_mode<synchronous>, transform_indices = @transform_2, window_bounds = array<i64: 128, 128>}, {pipeline_mode = #tpu.pipeline_mode<synchronous>, transform_indices = @transform_3, window_bounds = array<i64: 128, 8>}, {transform_indices = @transform_4, window_bounds = array<i64: 1, 1>}, {transform_indices = @transform_5, window_bounds = array<i64: 1, 128>}]} {
    %c0 = arith.constant 0 : index
    %c0_0 = arith.constant 0 : index
    %0 = vector.load %arg1[%c0, %c0_0] : memref<128x128xf32, #tpu.memory_space<vmem>>, vector<128x128xf32>
    %c0_1 = arith.constant 0 : index
    %c0_2 = arith.constant 0 : index
    %1 = vector.load %arg4[%c0_1, %c0_2] : memref<128x8xf32, #tpu.memory_space<vmem>>, vector<128x8xf32>
    %2 = vector.extract_strided_slice %1 {offsets = [0, 0], sizes = [128, 1], strides = [1, 1]} : vector<128x8xf32> to vector<128x1xf32>
    %3 = vector.extract_strided_slice %1 {offsets = [0, 1], sizes = [128, 1], strides = [1, 1]} : vector<128x8xf32> to vector<128x1xf32>
    %4 = vector.extract_strided_slice %1 {offsets = [0, 2], sizes = [128, 1], strides = [1, 1]} : vector<128x8xf32> to vector<128x1xf32>
    %c0_3 = arith.constant 0 : index
    %c0_4 = arith.constant 0 : index
    %5 = vector.load %arg2[%c0_3, %c0_4] : memref<128x128xf32, #tpu.memory_space<vmem>>, vector<128x128xf32>
    %cst = arith.constant dense<0.000000e+00> : vector<128x128xf32>
    %6 = tpu.matmul %5, %0, %cst {dimension_numbers = #tpu.dot_dimension_numbers<[1], [0], [0], [1], [0, 0, 1, 1], [], []>} : vector<128x128xf32>, vector<128x128xf32>, vector<128x128xf32> -> vector<128x128xf32>
    %7 = vector.broadcast %2 : vector<128x1xf32> to vector<128x128xf32>
    %8 = arith.addf %6, %7 : vector<128x128xf32>
    %cst_5 = arith.constant 0.000000e+00 : f32
    %9 = vector.broadcast %cst_5 : f32 to vector<128x128xf32>
    %10 = arith.maximumf %8, %9 : vector<128x128xf32>
    %c0_6 = arith.constant 0 : index
    %c0_7 = arith.constant 0 : index
    %11 = vector.load %arg3[%c0_6, %c0_7] : memref<128x128xf32, #tpu.memory_space<vmem>>, vector<128x128xf32>
    %cst_8 = arith.constant dense<0.000000e+00> : vector<128x128xf32>
    %12 = tpu.matmul %11, %10, %cst_8 {dimension_numbers = #tpu.dot_dimension_numbers<[1], [0], [0], [1], [0, 0, 1, 1], [], []>} : vector<128x128xf32>, vector<128x128xf32>, vector<128x128xf32> -> vector<128x128xf32>
    %13 = vector.broadcast %3 : vector<128x1xf32> to vector<128x128xf32>
    %14 = arith.addf %12, %13 : vector<128x128xf32>
    %cst_9 = arith.constant 0.000000e+00 : f32
    %15 = vector.broadcast %cst_9 : f32 to vector<128x128xf32>
    %16 = arith.maximumf %14, %15 : vector<128x128xf32>
    %17 = vector.broadcast %4 : vector<128x1xf32> to vector<128x128xf32>
    %18 = arith.mulf %16, %17 : vector<128x128xf32>
    %cst_10 = arith.constant dense<0.000000e+00> : vector<128xf32>
    %19 = vector.multi_reduction <add>, %18, %cst_10 [0] : vector<128x128xf32> to vector<128xf32>
    %20 = vector.shape_cast %19 : vector<128xf32> to vector<1x128xf32>
    %c0_11 = arith.constant 0 : index
    %c0_12 = arith.constant 0 : index
    %21 = memref.load %arg5[%c0_11, %c0_12] : memref<1x1xf32, #tpu.memory_space<smem>>
    %22 = vector.broadcast %21 : f32 to vector<1x128xf32>
    %23 = arith.addf %20, %22 : vector<1x128xf32>
    %c0_13 = arith.constant 0 : index
    %c0_14 = arith.constant 0 : index
    %24 = vector.load %arg6[%c0_13, %c0_14] : memref<1x128xf32, #tpu.memory_space<vmem>>, vector<1x128xf32>
    tpu.vector_store %arg6[%c0_13, %c0_14], %23 {strides = array<i32>} : memref<1x128xf32, #tpu.memory_space<vmem>>, vector<1x128xf32>,
    return
  }
  func.func @transform_0(%arg0: i32) -> (i32, i32) {
    %c0_i32 = arith.constant 0 : i32
    %c0_i32_0 = arith.constant 0 : i32
    return %c0_i32, %arg0 : i32, i32
  }
  func.func @transform_1(%arg0: i32) -> (i32, i32) {
    %c0_i32 = arith.constant 0 : i32
    %c0_i32_0 = arith.constant 0 : i32
    %c0_i32_1 = arith.constant 0 : i32
    return %c0_i32, %c0_i32_0 : i32, i32
  }
  func.func @transform_2(%arg0: i32) -> (i32, i32) {
    %c0_i32 = arith.constant 0 : i32
    %c0_i32_0 = arith.constant 0 : i32
    %c0_i32_1 = arith.constant 0 : i32
    return %c0_i32, %c0_i32_0 : i32, i32
  }
  func.func @transform_3(%arg0: i32) -> (i32, i32) {
    %c0_i32 = arith.constant 0 : i32
    %c0_i32_0 = arith.constant 0 : i32
    %c0_i32_1 = arith.constant 0 : i32
    return %c0_i32, %c0_i32_0 : i32, i32
  }
  func.func @transform_4(%arg0: i32) -> (i32, i32) {
    %c0_i32 = arith.constant 0 : i32
    %c0_i32_0 = arith.constant 0 : i32
    %c0_i32_1 = arith.constant 0 : i32
    return %c0_i32, %c0_i32_0 : i32, i32
  }
  func.func @transform_5(%arg0: i32) -> (i32, i32) {
    %c0_i32 = arith.constant 0 : i32
    %c0_i32_0 = arith.constant 0 : i32
    return %c0_i32, %arg0 : i32, i32
  }
}

</mosaic_0001>

<bundles_post_ra>
// kernel: tpu_custom_call.1
= control target key start
LH: loop header
LB: loop body
LE: loop exit
PB: predicated region body
PF: predicated region fallthrough
CT: control target
= control target key end

     0   :  { %11 = vsyncpa [#allocation4], 0  ;;  %s1315_s0 = inlined_call_operand.vmem [shape: f32[128,128], index: 0, kind: input, shape index: {}]   ;;  %s1316_s1 = inlined_call_operand.hbm [shape: f32[128,128], index: 1, kind: input, shape index: {}]   ;;  %s1317_s2 = inlined_call_operand.hbm [shape: f32[128,128], index: 2, kind: input, shape index: {}]   ;;  %s1318_s3 = inlined_call_operand.vmem [shape: f32[128,8], index: 3, kind: input, shape index: {}]   ;;  %s1319_s4 = inlined_call_operand.<no memory space> [shape: f32[1,1], index: 4, kind: input, shape index: {}]   ;;  %s1320_s5 = inlined_call_operand.hbm [shape: f32[1,128], index: 5, kind: output, shape index: {}]  }
   0x1   :  { %12 = vsyncpa [#allocation7], 0 }
   0x2   :  { %13 = vsyncpa [#allocation5], 0  ;;  %s1038_s18 = smov [#allocation3]   ;;  %s966_s22 = scalar_lea.hbm %s1316_s1, 2048 }
   0x3   :  { %s21_s19 = sshll.u32 %s1038_s18, 4  ;;  %p967_p0 = scmp.ne.s32.totalorder %s1316_s1, %s966_s22  ;;  %s22_s19 = int_to_ptr.vmem [resolvable:$true] %s21_s19 }
   0x4   :  { %p970_p1 = scmp.lt.u32.totalorder %s966_s22, %s1316_s1 }
   0x6   :  { %p972_p2 = pnand %p970_p1, %p967_p0 }
   0x8   :  { %975 = shalt.err (!%p972_p2)
}
   0x9   :  { %s976_s27 = scalar_lea.vmem %s22_s19, 2048  ;;  %p981_p4 = scmp.lt.s32.totalorder %s22_s19, %s22_s19 }
   0xa   :  { %p977_p3 = scmp.ne.s32.totalorder %s22_s19, %s976_s27  ;;  %p982_p5 = scmp.lt.s32.totalorder %s976_s27, %s976_s27 }
   0xc   :  { %p983_p6 = por %p982_p5, %p981_p4 }
   0xe   :  { %p984_p7 = pnand %p983_p6, %p977_p3 }
  0x10   :  { %987 = shalt.err (!%p984_p7)
}
  0x11   :  { %s1039_s28 = smov 128   ;;  %s1040_s29 = smov 8  }
  0x12   :  { %27 = dma.hbm_to_vmem [thread:$0]  %s1316_s1, 2048, %s22_s19, [#allocation4], %s1039_s28, %s1039_s28, %s1040_s29  }
  0x13   :  { %s1041_s7 = smov [#allocation6]   ;;  %s988_s11 = scalar_lea.hbm %s1317_s2, 2048 }
  0x14   :  { %s33_s8 = sshll.u32 %s1041_s7, 4  ;;  %p989_p8 = scmp.ne.s32.totalorder %s1317_s2, %s988_s11  ;;  %s34_s8 = int_to_ptr.vmem [resolvable:$true] %s33_s8 }
  0x15   :  { %p992_p9 = scmp.lt.u32.totalorder %s988_s11, %s1317_s2 }
  0x17   :  { %p994_p10 = pnand %p992_p9, %p989_p8 }
  0x19   :  { %997 = shalt.err (!%p994_p10)
}
  0x1a   :  { %s998_s16 = scalar_lea.vmem %s34_s8, 2048  ;;  %p1003_p12 = scmp.lt.s32.totalorder %s34_s8, %s34_s8 }
  0x1b   :  { %p999_p11 = scmp.ne.s32.totalorder %s34_s8, %s998_s16  ;;  %p1004_p13 = scmp.lt.s32.totalorder %s998_s16, %s998_s16 }
  0x1d   :  { %p1005_p0 = por %p1004_p13, %p1003_p12 }
  0x1f   :  { %p1006_p1 = pnand %p1005_p0, %p999_p11 }
  0x21   :  { %1009 = shalt.err (!%p1006_p1)
}
  0x22   :  { %39 = dma.hbm_to_vmem [thread:$0]  %s1317_s2, 2048, %s34_s8, [#allocation7], %s1039_s28, %s1039_s28, %s1040_s29  }
  0x23   :  { %1032 = dma.done.wait [#allocation4], 2048  }
  0x24   :  { %1033 = vsyncadd [#allocation4], 4294965248 }
  0x25   :  { %1034 = dma.done.wait [#allocation7], 2048  }
  0x26   :  { %1035 = vsyncadd [#allocation7], 4294965248  ;;  %v1042_v0 = vmov 0   ;;  %v50_v1 = vld [vmem:[%s1315_s0] sm:$0xff]  ;;  %v51_v2 = vld [vmem:[%s1315_s0 + $0x8] sm:$0xff]  ;;  %v1043_v58 = vmov 1  }
  0x27   :  { %949 = vset.pattern.permute.xlu0 %v1042_v0  ;;  %950 = vset.pattern.permute.xlu1 %v1042_v0  ;;  %v52_v3 = vld [vmem:[%s1315_s0 + $0x10] sm:$0xff]  ;;  %v877_v4 = vpack.c.bf16 %v51_v2, %v50_v1  ;;  %v53_v5 = vld [vmem:[%s1315_s0 + $0x18] sm:$0xff]  ;;  %v54_v7 = vld [vmem:[%s1315_s0 + $0x20] sm:$0xff]  ;;  %v1044_v59 = vmov 2   ;;  %s1045_s27 = smov [#allocation8]  }
  0x28   :  { %v881_v6 = vpack.c.bf16 %v53_v5, %v52_v3  ;;  %v55_v8 = vld [vmem:[%s1315_s0 + $0x28] sm:$0xff]  ;;  %v82_v10 = vld [vmem:[#allocation3] sm:$0xff]  ;;  %v56_v11 = vld [vmem:[%s1315_s0 + $0x30] sm:$0xff]  ;;  %s691_s28 = sshll.u32 %s1045_s27, 4  ;;  %s692_s28 = int_to_ptr.vmem [resolvable:$true] %s691_s28 }
  0x29   :  { %878 = vmatprep.subr.bf16.mxu0 %v877_v4  ;;  %v885_v9 = vpack.c.bf16 %v55_v8, %v54_v7  ;;  %v57_v12 = vld [vmem:[%s1315_s0 + $0x38] sm:$0xff]  ;;  %797 = vmatprep.mubr.f32.mxu0 %v82_v10  ;;  %v58_v14 = vld [vmem:[%s1315_s0 + $0x40] sm:$0xff]  ;;  %v59_v15 = vld [vmem:[%s1315_s0 + $0x48] sm:$0xff]  ;;  %s1010_s29 = scalar_lea.vmem %s692_s28, 16  ;;  %s1014_s30 = scalar_lea.vmem %s692_s28, 32 }
  0x2a   :  { %880 = vmatpush3.bf16.msra.mxu0 %v877_v4  ;;  %v889_v13 = vpack.c.bf16 %v57_v12, %v56_v11  ;;  %v1133_v16 = vld [vmem:[%s1318_s3] sm:$0xff]  ;;  %v1139_v17 = vld [vmem:[%s1318_s3 + $0x10] sm:$0xff]  ;;  %v1145_v18 = vld [vmem:[%s1318_s3 + $0x8] sm:$0xff]  ;;  %v893_v19 = vpack.c.bf16 %v59_v15, %v58_v14  ;;  %p1011_p2 = scmp.ne.s32.totalorder %s692_s28, %s1010_s29  ;;  %p1015_p3 = scmp.lt.s32.totalorder %s692_s28, %s692_s28 }
  0x2b   :  { %882 = vmatprep.subr.bf16.mxu0 %v881_v6  ;;  %100 = vperm.xlu0 %949, %v1133_v16   ;;  %v1150_v20 = vld [vmem:[%s1318_s3 + $0x18] sm:$0xff]  ;;  %v60_v21 = vld [vmem:[%s1315_s0 + $0x50] sm:$0xff]  ;;  %v1163_v23 = vld [vmem:[%s1318_s3 + $0x20] sm:$0xff]  ;;  %p1016_p4 = scmp.lt.s32.totalorder %s1014_s30, %s1010_s29 }
  0x2c   :  { %110 = vperm.xlu1 %950, %v1139_v17   ;;  %v61_v22 = vld [vmem:[%s1315_s0 + $0x58] sm:$0xff]  ;;  %v1168_v25 = vld [vmem:[%s1318_s3 + $0x28] sm:$0xff]  ;;  %v62_v26 = vld [vmem:[%s1315_s0 + $0x60] sm:$0xff] }
  0x2d   :  { %v897_v24 = vpack.c.bf16 %v61_v22, %v60_v21  ;;  %v63_v27 = vld [vmem:[%s1315_s0 + $0x68] sm:$0xff]  ;;  %v1181_v28 = vld [vmem:[%s1318_s3 + $0x30] sm:$0xff]  ;;  %v1186_v30 = vld [vmem:[%s1318_s3 + $0x38] sm:$0xff]  ;;  %p1017_p5 = por %p1016_p4, %p1015_p3 }
  0x2e   :  { %884 = vmatpush3.bf16.msra.mxu0 %v881_v6  ;;  %v901_v29 = vpack.c.bf16 %v63_v27, %v62_v26  ;;  %v64_v31 = vld [vmem:[%s1315_s0 + $0x70] sm:$0xff]  ;;  %v65_v32 = vld [vmem:[%s1315_s0 + $0x78] sm:$0xff]  ;;  %v1199_v33 = vld [vmem:[%s1318_s3 + $0x40] sm:$0xff] }
  0x2f   :  { %886 = vmatprep.subr.bf16.mxu0 %v885_v9  ;;  %105 = vperm.xlu0 %949, %v1145_v18   ;;  %v905_v34 = vpack.c.bf16 %v65_v32, %v64_v31  ;;  %v1204_v35 = vld [vmem:[%s1318_s3 + $0x48] sm:$0xff]  ;;  %v1211_v36 = vld [vmem:[%s1318_s3 + $0x50] sm:$0xff]  ;;  %v1216_v37 = vld [vmem:[%s1318_s3 + $0x58] sm:$0xff]  ;;  %p1018_p6 = pnand %p1017_p5, %p1011_p2 }
  0x30   :  { %115 = vperm.xlu1 %950, %v1150_v20   ;;  %v83_v38 = vld [vmem:[#allocation3 + $0x8] sm:$0xff]  ;;  %v1223_v39 = vld [vmem:[%s1318_s3 + $0x60] sm:$0xff]  ;;  %v84_v40 = vld [vmem:[#allocation3 + $0x10] sm:$0xff] }
  0x31   :  { %v1228_v41 = vld [vmem:[%s1318_s3 + $0x68] sm:$0xff]  ;;  %v85_v42 = vld [vmem:[#allocation3 + $0x18] sm:$0xff]  ;;  %v1235_v43 = vld [vmem:[%s1318_s3 + $0x70] sm:$0xff] }
  0x32   :  { %888 = vmatpush3.bf16.msra.mxu0 %v885_v9  ;;  %v86_v44 = vld [vmem:[#allocation3 + $0x20] sm:$0xff]  ;;  %v1240_v45 = vld [vmem:[%s1318_s3 + $0x78] sm:$0xff]  ;;  %v87_v46 = vld [vmem:[#allocation3 + $0x28] sm:$0xff] }
  0x33   :  { %890 = vmatprep.subr.bf16.mxu0 %v889_v13  ;;  %120 = vperm.xlu0 %949, %v1163_v23   ;;  %v88_v47 = vld [vmem:[#allocation3 + $0x30] sm:$0xff]  ;;  %v89_v48 = vld [vmem:[#allocation3 + $0x38] sm:$0xff]  ;;  %v90_v49 = vld [vmem:[#allocation3 + $0x40] sm:$0xff] }
  0x34   :  { %125 = vperm.xlu1 %950, %v1168_v25   ;;  %v91_v50 = vld [vmem:[#allocation3 + $0x48] sm:$0xff]  ;;  %v92_v51 = vld [vmem:[#allocation3 + $0x50] sm:$0xff]  ;;  %v93_v52 = vld [vmem:[#allocation3 + $0x58] sm:$0xff] }
  0x35   :  { %v94_v53 = vld [vmem:[#allocation3 + $0x60] sm:$0xff]  ;;  %v95_v54 = vld [vmem:[#allocation3 + $0x68] sm:$0xff]  ;;  %v96_v55 = vld [vmem:[#allocation3 + $0x70] sm:$0xff] }
  0x36   :  { %892 = vmatpush3.bf16.msra.mxu0 %v889_v13  ;;  %v97_v56 = vld [vmem:[#allocation3 + $0x78] sm:$0xff]  ;;  %v339_v57 = vld [vmem:[#allocation6] sm:$0xff] }
  0x37   :  { %894 = vmatprep.subr.bf16.mxu0 %v893_v19  ;;  %130 = vperm.xlu0 %949, %v1181_v28  }
  0x38   :  { %135 = vperm.xlu1 %950, %v1186_v30   ;;  %853 = vmatprep.mubr.f32.mxu1 %v339_v57 }
  0x3a   :  { %896 = vmatpush3.bf16.msra.mxu0 %v893_v19 }
  0x3b   :  { %898 = vmatprep.subr.bf16.mxu0 %v897_v24  ;;  %140 = vperm.xlu0 %949, %v1199_v33  }
  0x3c   :  { %145 = vperm.xlu1 %950, %v1204_v35  }
  0x3e   :  { %900 = vmatpush3.bf16.msra.mxu0 %v897_v24 }
  0x3f   :  { %902 = vmatprep.subr.bf16.mxu0 %v901_v29  ;;  %150 = vperm.xlu0 %949, %v1211_v36  }
  0x40   :  { %155 = vperm.xlu1 %950, %v1216_v37  }
  0x42   :  { %904 = vmatpush3.bf16.msra.mxu0 %v901_v29 }
  0x43   :  { %906 = vmatprep.subr.bf16.mxu0 %v905_v34  ;;  %160 = vperm.xlu0 %949, %v1223_v39  }
  0x44   :  { %165 = vperm.xlu1 %950, %v1228_v41  }
  0x46   :  { %908 = vmatpush3.bf16.msra.mxu0 %v905_v34 }
  0x47   :  { %170 = vperm.xlu0 %949, %v1235_v43  }
  0x48   :  { %175 = vperm.xlu1 %950, %v1240_v45  }
  0x49   :  { %798 = vmatmul.mubr.f32.vlgmr.msra.gmra.mrb[0].mxu0 %v83_v38 }
  0x4a   :  { %800 = vmatprep.mubr.f32.mxu0 %v84_v40 }
  0x4b   :  { %953 = vset.pattern.permute.xlu0 %v1044_v59 }
  0x4c   :  { %951 = vset.pattern.permute.xlu1 %v1043_v58  ;;  %585 = vperm.xlu0 %953, %v1145_v18  }
  0x4d   :  { %801 = vmatmul.mubr.f32.gmra.mrb[2].mxu0 %v85_v42  ;;  %360 = vperm.xlu1 %951, %v1145_v18  }
  0x4e   :  { %803 = vmatprep.mubr.f32.mxu0 %v86_v44 }
  0x50   :  { %597 = vperm.xlu0 %953, %v1163_v23  }
  0x51   :  { %804 = vmatmul.mubr.f32.gmra.mrb[4].mxu0 %v87_v46  ;;  %364 = vperm.xlu1 %951, %v1139_v17  }
  0x52   :  { %806 = vmatprep.mubr.f32.mxu0 %v88_v47 }
  0x54   :  { %609 = vperm.xlu0 %953, %v1186_v30  }
  0x55   :  { %807 = vmatmul.mubr.f32.gmra.mrb[6].mxu0 %v89_v48  ;;  %952 = vset.pattern.permute.xlu1 %v1044_v59 }
  0x56   :  { %809 = vmatprep.mubr.f32.mxu0 %v90_v49  ;;  %581 = vperm.xlu1 %952, %v1133_v16  }
  0x58   :  { %621 = vperm.xlu0 %953, %v1211_v36  }
  0x59   :  { %810 = vmatmul.mubr.f32.gmra.mrb[8].mxu0 %v91_v50 }
  0x5a   :  { %812 = vmatprep.mubr.f32.mxu0 %v92_v51  ;;  %954 = vset.pattern.permute.xlu1 %v1043_v58 }
  0x5b   :  { %372 = vperm.xlu1 %954, %v1163_v23  }
  0x5c   :  { %961 = vset.pattern.permute.xlu0 %v1043_v58 }
  0x5d   :  { %813 = vmatmul.mubr.f32.gmra.mrb[10].mxu0 %v93_v52  ;;  %356 = vperm.xlu0 %961, %v1133_v16  }
  0x5e   :  { %815 = vmatprep.mubr.f32.mxu0 %v94_v53 }
  0x5f   :  { %955 = vset.pattern.permute.xlu1 %v1044_v59 }
  0x60   :  { %589 = vperm.xlu1 %955, %v1139_v17  }
  0x61   :  { %816 = vmatmul.mubr.f32.gmra.mrb[12].mxu0 %v95_v54  ;;  %368 = vperm.xlu0 %961, %v1150_v20  }
  0x62   :  { %818 = vmatprep.mubr.f32.mxu0 %v96_v55 }
  0x64   :  { %593 = vperm.xlu1 %955, %v1150_v20  }
  0x65   :  { %819 = vmatmul.mubr.f32.gmra.mrb[14].mxu0 %v97_v56  ;;  %376 = vperm.xlu0 %961, %v1168_v25  }
  0x68   :  { %956 = vset.pattern.permute.xlu1 %v1043_v58 }
  0x69   :  { %380 = vperm.xlu1 %956, %v1181_v28   ;;  %388 = vperm.xlu0 %961, %v1199_v33  }
  0x6d   :  { %384 = vperm.xlu1 %956, %v1186_v30   ;;  %400 = vperm.xlu0 %961, %v1216_v37  }
  0x71   :  { %957 = vset.pattern.permute.xlu1 %v1044_v59  ;;  %412 = vperm.xlu0 %961, %v1235_v43  }
  0x72   :  { %601 = vperm.xlu1 %957, %v1168_v25  }
  0x75   :  { %964 = vset.pattern.permute.xlu0 %v1044_v59 }
  0x76   :  { %605 = vperm.xlu1 %957, %v1181_v28   ;;  %633 = vperm.xlu0 %964, %v1228_v41  }
  0x7a   :  { %958 = vset.pattern.permute.xlu1 %v1043_v58 }
  0x7b   :  { %392 = vperm.xlu1 %958, %v1204_v35  }
  0x7f   :  { %396 = vperm.xlu1 %958, %v1211_v36  }
  0x83   :  { %959 = vset.pattern.permute.xlu1 %v1044_v59 }
  0x84   :  { %613 = vperm.xlu1 %959, %v1199_v33  }
  0x88   :  { %617 = vperm.xlu1 %959, %v1204_v35  }
  0x8c   :  { %960 = vset.pattern.permute.xlu1 %v1043_v58 }
  0x8d   :  { %404 = vperm.xlu1 %960, %v1223_v39  }
  0x91   :  { %408 = vperm.xlu1 %960, %v1228_v41  }
  0x95   :  { %962 = vset.pattern.permute.xlu1 %v1044_v59 }
  0x96   :  { %625 = vperm.xlu1 %962, %v1216_v37  }
  0x9a   :  { %629 = vperm.xlu1 %962, %v1223_v39  }
  0x9e   :  { %963 = vset.pattern.permute.xlu1 %v1043_v58 }
  0x9f   :  { %416 = vperm.xlu1 %963, %v1240_v45  }
  0xa3   :  { %965 = vset.pattern.permute.xlu1 %v1044_v59 }
  0xa4   :  { %637 = vperm.xlu1 %965, %v1235_v43  }
  0xa8   :  { %641 = vperm.xlu1 %965, %v1240_v45   ;;  %v340_v45 = vld [vmem:[#allocation6 + $0x8] sm:$0xff] }
  0xaa   :  { %v101_v61 = vpop.permute.xlu0 %100 }
  0xab   :  { %v111_v60 = vpop.permute.xlu1 %110 }
  0xae   :  { %v106_v63 = vpop.permute.xlu0 %105 }
  0xaf   :  { %v116_v62 = vpop.permute.xlu1 %115 }
  0xb2   :  { %v121_v1 = vpop.permute.xlu0 %120 }
  0xb3   :  { %v126_v0 = vpop.permute.xlu1 %125 }
  0xb6   :  { %v131_v10 = vpop.permute.xlu0 %130 }
  0xb7   :  { %v136_v7 = vpop.permute.xlu1 %135 }
  0xba   :  { %v141_v23 = vpop.permute.xlu0 %140 }
  0xbb   :  { %v146_v20 = vpop.permute.xlu1 %145 }
  0xbe   :  { %v151_v35 = vpop.permute.xlu0 %150 }
  0xbf   :  { %v156_v32 = vpop.permute.xlu1 %155 }
  0xc2   :  { %v161_v50 = vpop.permute.xlu0 %160 }
  0xc3   :  { %v166_v47 = vpop.permute.xlu1 %165 }
  0xc6   :  { %v171_v43 = vpop.permute.xlu0 %170 }
  0xc7   :  { %v176_v59 = vpop.permute.xlu1 %175 }
 0x11c   :  { %v799_v2 = vpop.f32.mrb[0].mxu0 }
 0x11d   :  { %v250_v3 = vadd.f32 %v799_v2, %v106_v63  ;;  %v244_v4 = vpop.f32.mrb[1].mxu0 }
 0x11e   :  { %v245_v5 = vadd.f32 %v244_v4, %v101_v61 }
 0x11f   :  { %v324_v6 = vmax.f32 %v250_v3, 0.0 }
 0x120   :  { %v323_v8 = vmax.f32 %v245_v5, 0.0  ;;  %v802_v9 = vpop.f32.mrb[2].mxu0  ;;  %v341_v5 = vld [vmem:[#allocation6 + $0x10] sm:$0xff] }
 0x121   :  { %v260_v11 = vadd.f32 %v802_v9, %v116_v62  ;;  %v254_v12 = vpop.f32.mrb[3].mxu0  ;;  %v345_v9 = vld [vmem:[#allocation6 + $0x30] sm:$0xff] }
 0x122   :  { %v255_v13 = vadd.f32 %v254_v12, %v111_v60  ;;  %v909_v14 = vpack.c.bf16 %v324_v6, %v323_v8  ;;  %v342_v6 = vld [vmem:[#allocation6 + $0x18] sm:$0xff]  ;;  %v344_v8 = vld [vmem:[#allocation6 + $0x28] sm:$0xff] }
 0x123   :  { %v326_v15 = vmax.f32 %v260_v11, 0.0  ;;  %v347_v11 = vld [vmem:[#allocation6 + $0x40] sm:$0xff]  ;;  %v348_v12 = vld [vmem:[#allocation6 + $0x48] sm:$0xff] }
 0x124   :  { %v325_v16 = vmax.f32 %v255_v13, 0.0  ;;  %v805_v17 = vpop.f32.mrb[4].mxu0  ;;  %910 = vmatprep.subr.bf16.mxu1 %v909_v14  ;;  %v349_v13 = vld [vmem:[#allocation6 + $0x50] sm:$0xff] }
 0x125   :  { %v270_v18 = vadd.f32 %v805_v17, %v126_v0  ;;  %v264_v19 = vpop.f32.mrb[5].mxu0  ;;  %912 = vmatpush3.bf16.msra.mxu1 %v909_v14  ;;  %v350_v14 = vld [vmem:[#allocation6 + $0x58] sm:$0xff]  ;;  %v353_v17 = vld [vmem:[#allocation6 + $0x70] sm:$0xff] }
 0x126   :  { %v913_v21 = vpack.c.bf16 %v326_v15, %v325_v16  ;;  %v265_v22 = vadd.f32 %v264_v19, %v121_v1  ;;  %v351_v15 = vld [vmem:[#allocation6 + $0x60] sm:$0xff]  ;;  %v352_v16 = vld [vmem:[#allocation6 + $0x68] sm:$0xff]  ;;  %v361_v19 = vpop.permute.xlu1 %360 }
 0x127   :  { %v328_v24 = vmax.f32 %v270_v18, 0.0  ;;  %v354_v18 = vld [vmem:[#allocation6 + $0x78] sm:$0xff] }
 0x128   :  { %v327_v25 = vmax.f32 %v265_v22, 0.0  ;;  %v808_v26 = vpop.f32.mrb[6].mxu0  ;;  %914 = vmatprep.subr.bf16.mxu1 %v913_v21 }
 0x129   :  { %v280_v27 = vadd.f32 %v808_v26, %v136_v7  ;;  %v274_v28 = vpop.f32.mrb[7].mxu0  ;;  %916 = vmatpush3.bf16.msra.mxu1 %v913_v21  ;;  %v343_v7 = vld [vmem:[#allocation6 + $0x20] sm:$0xff] }
 0x12a   :  { %v917_v29 = vpack.c.bf16 %v328_v24, %v327_v25  ;;  %v275_v30 = vadd.f32 %v274_v28, %v131_v10  ;;  %v346_v10 = vld [vmem:[#allocation6 + $0x38] sm:$0xff] }
 0x12b   :  { %v330_v31 = vmax.f32 %v280_v27, 0.0 }
 0x12c   :  { %v329_v33 = vmax.f32 %v275_v30, 0.0  ;;  %v811_v34 = vpop.f32.mrb[8].mxu0  ;;  %918 = vmatprep.subr.bf16.mxu1 %v917_v29 }
 0x12d   :  { %v290_v36 = vadd.f32 %v811_v34, %v146_v20  ;;  %v284_v37 = vpop.f32.mrb[9].mxu0  ;;  %920 = vmatpush3.bf16.msra.mxu1 %v917_v29  ;;  %v365_v20 = vpop.permute.xlu1 %364 }
 0x12e   :  { %v921_v38 = vpack.c.bf16 %v330_v31, %v329_v33  ;;  %v285_v39 = vadd.f32 %v284_v37, %v141_v23  ;;  %v586_v29 = vpop.permute.xlu0 %585 }
 0x12f   :  { %v332_v40 = vmax.f32 %v290_v36, 0.0 }
 0x130   :  { %v331_v41 = vmax.f32 %v285_v39, 0.0  ;;  %v814_v42 = vpop.f32.mrb[10].mxu0  ;;  %922 = vmatprep.subr.bf16.mxu1 %v921_v38 }
 0x131   :  { %v300_v44 = vadd.f32 %v814_v42, %v156_v32  ;;  %v294_v46 = vpop.f32.mrb[11].mxu0  ;;  %924 = vmatpush3.bf16.msra.mxu1 %v921_v38  ;;  %v582_v21 = vpop.permute.xlu1 %581 }
 0x132   :  { %v925_v48 = vpack.c.bf16 %v332_v40, %v331_v41  ;;  %v295_v49 = vadd.f32 %v294_v46, %v151_v35  ;;  %v598_v31 = vpop.permute.xlu0 %597 }
 0x133   :  { %v334_v51 = vmax.f32 %v300_v44, 0.0 }
 0x134   :  { %v333_v52 = vmax.f32 %v295_v49, 0.0  ;;  %v817_v53 = vpop.f32.mrb[12].mxu0  ;;  %926 = vmatprep.subr.bf16.mxu1 %v925_v48 }
 0x135   :  { %v310_v54 = vadd.f32 %v817_v53, %v166_v47  ;;  %v304_v55 = vpop.f32.mrb[13].mxu0  ;;  %928 = vmatpush3.bf16.msra.mxu1 %v925_v48  ;;  %v373_v22 = vpop.permute.xlu1 %372 }
 0x136   :  { %v929_v56 = vpack.c.bf16 %v334_v51, %v333_v52  ;;  %v305_v57 = vadd.f32 %v304_v55, %v161_v50  ;;  %v610_v33 = vpop.permute.xlu0 %609 }
 0x137   :  { %v336_v58 = vmax.f32 %v310_v54, 0.0 }
 0x138   :  { %v335_v60 = vmax.f32 %v305_v57, 0.0  ;;  %v820_v61 = vpop.f32.mrb[14].mxu0  ;;  %930 = vmatprep.subr.bf16.mxu1 %v929_v56 }
 0x139   :  { %v320_v62 = vadd.f32 %v820_v61, %v176_v59  ;;  %v314_v63 = vpop.f32.mrb[15].mxu0  ;;  %932 = vmatpush3.bf16.msra.mxu1 %v929_v56  ;;  %v590_v23 = vpop.permute.xlu1 %589 }
 0x13a   :  { %v933_v0 = vpack.c.bf16 %v336_v58, %v335_v60  ;;  %v315_v1 = vadd.f32 %v314_v63, %v171_v43  ;;  %v1293_v35 = vpop.permute.xlu0 %621 }
 0x13b   :  { %v338_v2 = vmax.f32 %v320_v62, 0.0 }
 0x13c   :  { %v337_v3 = vmax.f32 %v315_v1, 0.0  ;;  %934 = vmatprep.subr.bf16.mxu1 %v933_v0 }
 0x13d   :  { %936 = vmatpush3.bf16.msra.mxu1 %v933_v0  ;;  %v594_v24 = vpop.permute.xlu1 %593 }
 0x13e   :  { %v937_v4 = vpack.c.bf16 %v338_v2, %v337_v3  ;;  %v357_v37 = vpop.permute.xlu0 %356 }
 0x140   :  { %938 = vmatprep.subr.bf16.mxu1 %v937_v4 }
 0x141   :  { %940 = vmatpush3.bf16.msra.mxu1 %v937_v4  ;;  %v381_v25 = vpop.permute.xlu1 %380 }
 0x142   :  { %v369_v40 = vpop.permute.xlu0 %368 }
 0x144   :  { %854 = vmatmul.mubr.f32.vlgmr.msra.gmra.mrb[0].mxu1 %v340_v45 }
 0x145   :  { %856 = vmatprep.mubr.f32.mxu1 %v341_v5  ;;  %v385_v26 = vpop.permute.xlu1 %384 }
 0x146   :  { %v377_v55 = vpop.permute.xlu0 %376 }
 0x148   :  { %857 = vmatmul.mubr.f32.gmra.mrb[2].mxu1 %v342_v6 }
 0x149   :  { %859 = vmatprep.mubr.f32.mxu1 %v343_v7  ;;  %v602_v27 = vpop.permute.xlu1 %601 }
 0x14a   :  { %v389_v45 = vpop.permute.xlu0 %388 }
 0x14c   :  { %860 = vmatmul.mubr.f32.gmra.mrb[4].mxu1 %v344_v8 }
 0x14d   :  { %862 = vmatprep.mubr.f32.mxu1 %v345_v9  ;;  %v606_v28 = vpop.permute.xlu1 %605 }
 0x150   :  { %863 = vmatmul.mubr.f32.gmra.mrb[6].mxu1 %v346_v10 }
 0x151   :  { %865 = vmatprep.mubr.f32.mxu1 %v347_v11  ;;  %v393_v30 = vpop.permute.xlu1 %392 }
 0x154   :  { %866 = vmatmul.mubr.f32.gmra.mrb[8].mxu1 %v348_v12 }
 0x155   :  { %868 = vmatprep.mubr.f32.mxu1 %v349_v13  ;;  %v1291_v32 = vpop.permute.xlu1 %396 }
 0x158   :  { %869 = vmatmul.mubr.f32.gmra.mrb[10].mxu1 %v350_v14 }
 0x159   :  { %871 = vmatprep.mubr.f32.mxu1 %v351_v15  ;;  %v614_v34 = vpop.permute.xlu1 %613 }
 0x15c   :  { %872 = vmatmul.mubr.f32.gmra.mrb[12].mxu1 %v352_v16 }
 0x15d   :  { %874 = vmatprep.mubr.f32.mxu1 %v353_v17  ;;  %v618_v36 = vpop.permute.xlu1 %617 }
 0x160   :  { %875 = vmatmul.mubr.f32.gmra.mrb[14].mxu1 %v354_v18 }
 0x161   :  { %v1295_v38 = vpop.permute.xlu1 %404 }
 0x165   :  { %v409_v52 = vpop.permute.xlu1 %408 }
 0x169   :  { %v626_v63 = vpop.permute.xlu1 %625 }
 0x16d   :  { %v630_v16 = vpop.permute.xlu1 %629 }
 0x217   :  { %v855_v39 = vpop.f32.mrb[0].mxu1 }
 0x218   :  { %v491_v41 = vadd.f32 %v855_v39, %v361_v19  ;;  %v485_v42 = vpop.f32.mrb[1].mxu1 }
 0x219   :  { %v486_v44 = vadd.f32 %v485_v42, %v357_v37 }
 0x21a   :  { %v565_v46 = vmax.f32 %v491_v41, 0.0 }
 0x21b   :  { %v564_v47 = vmax.f32 %v486_v44, 0.0  ;;  %v858_v48 = vpop.f32.mrb[2].mxu1 }
 0x21c   :  { %v645_v49 = vmul.f32 %v586_v29, %v565_v46  ;;  %v501_v50 = vadd.f32 %v858_v48, %v369_v40  ;;  %v495_v51 = vpop.f32.mrb[3].mxu1 }
 0x21d   :  { %v644_v53 = vmul.f32 %v582_v21, %v564_v47  ;;  %v496_v54 = vadd.f32 %v495_v51, %v365_v20  ;;  %v401_v21 = vpop.permute.xlu0 %400 }
 0x21e   :  { %v567_v57 = vmax.f32 %v501_v50, 0.0 }
 0x21f   :  { %v660_v56 = vadd.f32 %v645_v49, %v644_v53  ;;  %v566_v58 = vmax.f32 %v496_v54, 0.0  ;;  %v861_v59 = vpop.f32.mrb[4].mxu1 }
 0x220   :  { %v511_v60 = vadd.f32 %v861_v59, %v377_v55  ;;  %v505_v61 = vpop.f32.mrb[5].mxu1  ;;  %v647_v0 = vmul.f32 %v594_v24, %v567_v57 }
 0x221   :  { %v646_v43 = vmul.f32 %v590_v23, %v566_v58  ;;  %v506_v62 = vadd.f32 %v505_v61, %v373_v22  ;;  %v413_v46 = vpop.permute.xlu0 %412 }
 0x222   :  { %v569_v2 = vmax.f32 %v511_v60, 0.0 }
 0x223   :  { %v661_v1 = vadd.f32 %v660_v56, %v646_v43  ;;  %v568_v3 = vmax.f32 %v506_v62, 0.0  ;;  %v864_v4 = vpop.f32.mrb[6].mxu1 }
 0x224   :  { %v521_v5 = vadd.f32 %v864_v4, %v385_v26  ;;  %v515_v6 = vpop.f32.mrb[7].mxu1  ;;  %v649_v10 = vmul.f32 %v602_v27, %v569_v2 }
 0x225   :  { %v648_v7 = vmul.f32 %v598_v31, %v568_v3  ;;  %v662_v8 = vadd.f32 %v661_v1, %v647_v0  ;;  %v516_v9 = vadd.f32 %v515_v6, %v381_v25  ;;  %v417_v25 = vpop.permute.xlu1 %416 }
 0x226   :  { %v571_v12 = vmax.f32 %v521_v5, 0.0 }
 0x227   :  { %v663_v11 = vadd.f32 %v662_v8, %v648_v7  ;;  %v570_v13 = vmax.f32 %v516_v9, 0.0  ;;  %v867_v14 = vpop.f32.mrb[8].mxu1  ;;  %v682_v7 = vstv %s1319_s4 }
 0x228   :  { %v531_v15 = vadd.f32 %v867_v14, %v393_v30  ;;  %v525_v17 = vpop.f32.mrb[9].mxu1  ;;  %v651_v22 = vmul.f32 %v610_v33, %v571_v12 }
 0x229   :  { %v650_v18 = vmul.f32 %v606_v28, %v570_v13  ;;  %v664_v19 = vadd.f32 %v663_v11, %v649_v10  ;;  %v526_v20 = vadd.f32 %v525_v17, %v389_v45  ;;  %v638_v51 = vpop.permute.xlu1 %637 }
 0x22a   :  { %v573_v24 = vmax.f32 %v531_v15, 0.0 }
 0x22b   :  { %v665_v23 = vadd.f32 %v664_v19, %v650_v18  ;;  %v572_v26 = vmax.f32 %v526_v20, 0.0  ;;  %v870_v29 = vpop.f32.mrb[10].mxu1 }
 0x22c   :  { %v541_v31 = vadd.f32 %v870_v29, %v401_v21  ;;  %v535_v37 = vpop.f32.mrb[11].mxu1  ;;  %v653_v41 = vmul.f32 %v618_v36, %v573_v24 }
 0x22d   :  { %v652_v27 = vmul.f32 %v614_v34, %v572_v26  ;;  %v666_v39 = vadd.f32 %v665_v23, %v651_v22  ;;  %v536_v40 = vadd.f32 %v535_v37, %v1291_v32  ;;  %v634_v32 = vpop.permute.xlu0 %633 }
 0x22e   :  { %v575_v42 = vmax.f32 %v541_v31, 0.0 }
 0x22f   :  { %v667_v30 = vadd.f32 %v666_v39, %v652_v27  ;;  %v574_v44 = vmax.f32 %v536_v40, 0.0  ;;  %v873_v28 = vpop.f32.mrb[12].mxu1 }
 0x230   :  { %v551_v47 = vadd.f32 %v873_v28, %v409_v52  ;;  %v545_v48 = vpop.f32.mrb[13].mxu1  ;;  %v655_v53 = vmul.f32 %v626_v63, %v575_v42 }
 0x231   :  { %v654_v33 = vmul.f32 %v1293_v35, %v574_v44  ;;  %v668_v49 = vadd.f32 %v667_v30, %v653_v41  ;;  %v546_v50 = vadd.f32 %v545_v48, %v1295_v38  ;;  %v642_v35 = vpop.permute.xlu1 %641 }
 0x232   :  { %v577_v34 = vmax.f32 %v551_v47, 0.0 }
 0x233   :  { %v669_v54 = vadd.f32 %v668_v49, %v654_v33  ;;  %v576_v55 = vmax.f32 %v546_v50, 0.0  ;;  %v876_v56 = vpop.f32.mrb[14].mxu1 }
 0x234   :  { %v561_v36 = vadd.f32 %v876_v56, %v417_v25  ;;  %v555_v57 = vpop.f32.mrb[15].mxu1  ;;  %v657_v61 = vmul.f32 %v634_v32, %v577_v34 }
 0x235   :  { %v656_v58 = vmul.f32 %v630_v16, %v576_v55  ;;  %v670_v59 = vadd.f32 %v669_v54, %v655_v53  ;;  %v556_v60 = vadd.f32 %v555_v57, %v413_v46 }
 0x236   :  { %v579_v43 = vmax.f32 %v561_v36, 0.0 }
 0x237   :  { %v671_v52 = vadd.f32 %v670_v59, %v656_v58  ;;  %v578_v62 = vmax.f32 %v556_v60, 0.0 }
 0x238   :  { %v659_v38 = vmul.f32 %v642_v35, %v579_v43 }
 0x239   :  { %v672_v0 = vadd.f32 %v671_v52, %v657_v61  ;;  %v658_v1 = vmul.f32 %v638_v51, %v578_v62 }
 0x23b   :  { %v673_v2 = vadd.f32 %v672_v0, %v658_v1 }
 0x23d   :  { %v674_v63 = vadd.f32 %v673_v2, %v659_v38 }
 0x23f   :  { %v675_v3 = vrot.slane %v674_v63, 4 }
 0x241   :  { %v676_v4 = vadd.f32 %v675_v3, %v674_v63 }
 0x243   :  { %v677_v45 = vrot.slane %v676_v4, 2 }
 0x245   :  { %v678_v5 = vadd.f32 %v677_v45, %v676_v4 }
 0x247   :  { %v679_v6 = vrot.slane %v678_v5, 1 }
 0x249   :  { %v680_v8 = vadd.f32 %v679_v6, %v678_v5 }
 0x24b   :  { %v683_v9 = vadd.f32 %v682_v7, %v680_v8 }
 0x24d   :  { %684 = vst [vmem:[#allocation8] sm:$0x1] %v683_v9 }
 0x24e   :  { %1021 = shalt.err (!%p1018_p6)
}
 0x24f   :  { %s1022_s8 = scalar_lea.hbm %s1320_s5, 16 }
 0x250   :  { %p1023_p7 = scmp.ne.s32.totalorder %s1320_s5, %s1022_s8  ;;  %p1026_p8 = scmp.lt.u32.totalorder %s1022_s8, %s1320_s5 }
 0x252   :  { %p1028_p9 = pnand %p1026_p8, %p1023_p7 }
 0x254   :  { %1031 = shalt.err (!%p1028_p9)
}
 0x255   :  { %694 = dma.vmem_to_hbm [thread:$0]  %s692_s28, 16, %s1320_s5, [#allocation5]  }
 0x256   :  { %1036 = dma.done.wait [#allocation5], 16  }
 0x257   :  { %1037 = vsyncadd [#allocation5], 4294967280 }
 0x258   :  { %698 = vsyncpa [#allocation4], 1 }
 0x259   :  { %699 = vsyncpa [#allocation7], 1 }
 0x25a   :  { %700 = vsyncpa [#allocation5], 1 }

</bundles_post_ra>
